<compile_context>
chip_gen: v7x
topology: tpu7x:2x2x1
jax: 0.10.0
libtpu: 0.0.40
codegen_flags: <defaults>
</compile_context>

<pallas_src>
import functools

import jax
import jax.numpy as jnp
from jax import lax
from jax.experimental import pallas as pl
from jax.experimental.pallas import tpu as pltpu

# ----------------------------- problem sizes -----------------------------
B, C_IN, H, W = 2, 4, 16, 16
C_OUT = 8
K = 3
NUM_CLASSES = 10

HW = H * W
M = B * HW                      # im2col rows (512)
KD = C_IN * K * K               # im2col cols (36)
LANE = 128                      # lane width; logits padded to this (lane-dense stores)

CONFIG = dict(random_start=True, step_size=0.1, epsilon=0.3, num_steps=2,
              train=True, box_type='white', ls_factor=0.1, ls_factor_2=0.0,
              alpha1=1.0, alpha2=1.0, r=2.0)


def _full_spec(shape):
    """Whole-array block for a grid=(1,) launch."""
    return pl.BlockSpec(shape, lambda i: (0,) * len(shape))


_ARB1 = pltpu.CompilerParams(dimension_semantics=("arbitrary",))


# ----------------------------- fused net forward -----------------------------

def _net_fwd_kernel(cols_ref, wc_ref, bc_ref, pool_ref, wf_ref, bf_ref,
                    logit_ref, prob_ref):
    # conv as one MXU matmul over im2col patches (bf16 inputs, f32 accumulate)
    pre = jnp.dot(cols_ref[...].astype(jnp.bfloat16),
                  wc_ref[...].astype(jnp.bfloat16),
                  preferred_element_type=jnp.float32) + bc_ref[...]      # (M, C_OUT)
    conv = jnp.maximum(pre, 0.0)
    # global pool as a 0/1 matmul (1/HW folded into wf); stays on the MXU
    fea = jnp.dot(pool_ref[...], conv,
                  preferred_element_type=jnp.float32)                    # (B, C_OUT)
    logits = jnp.dot(fea, wf_ref[...],
                     preferred_element_type=jnp.float32) + bf_ref[...]   # (B, LANE)
    logit_ref[...] = logits
    # fused softmax over the first NUM_CLASSES lanes (padding lanes masked out)
    lane = lax.broadcasted_iota(jnp.int32, logits.shape, 1)
    valid = lane < NUM_CLASSES
    mx = jnp.max(jnp.where(valid, logits, -jnp.inf), axis=-1, keepdims=True)
    e = jnp.where(valid, jnp.exp(logits - mx), 0.0)
    prob_ref[...] = e * pl.reciprocal(jnp.sum(e, axis=-1, keepdims=True), approx=True)


def fused_net_forward(cols, prep):
    return pl.pallas_call(
        _net_fwd_kernel,
        out_shape=(jax.ShapeDtypeStruct((B, LANE), jnp.float32),
                   jax.ShapeDtypeStruct((B, LANE), jnp.float32)),
        grid=(1,),
        in_specs=[_full_spec((M, KD)), _full_spec((KD, C_OUT)), _full_spec((1, C_OUT)),
                  _full_spec((B, M)), _full_spec((C_OUT, LANE)), _full_spec((1, LANE))],
        out_specs=(_full_spec((B, LANE)), _full_spec((B, LANE))),
        compiler_params=_ARB1,
    )(cols, prep['wc'], prep['bc'], prep['pool_bm'], prep['wf_p'], prep['bf_p'])


def _net_bwd_kernel(cols_ref, wc_ref, bc_ref, pool_ref, wf_t_ref, wc_t_ref, g_ref,
                    dcols_ref):
    # recompute ReLU mask (cheaper than storing (M, C_OUT) residuals through HBM)
    pre = jnp.dot(cols_ref[...].astype(jnp.bfloat16),
                  wc_ref[...].astype(jnp.bfloat16),
                  preferred_element_type=jnp.float32) + bc_ref[...]      # (M, C_OUT)
    dfea = jnp.dot(g_ref[...], wf_t_ref[...],
                   preferred_element_type=jnp.float32)                   # (B, C_OUT)
    dconv = jnp.dot(pool_ref[...], dfea,
                    preferred_element_type=jnp.float32)                  # (M, C_OUT)
    dpre = jnp.where(pre > 0.0, dconv, 0.0)
    dcols_ref[...] = jnp.dot(dpre.astype(jnp.bfloat16),
                             wc_t_ref[...].astype(jnp.bfloat16),
                             preferred_element_type=jnp.float32)         # (M, KD)


def fused_net_backward(cols, g, prep):
    return pl.pallas_call(
        _net_bwd_kernel,
        out_shape=jax.ShapeDtypeStruct((M, KD), jnp.float32),
        grid=(1,),
        in_specs=[_full_spec((M, KD)), _full_spec((KD, C_OUT)), _full_spec((1, C_OUT)),
                  _full_spec((M, B)), _full_spec((LANE, C_OUT)), _full_spec((C_OUT, KD)),
                  _full_spec((B, LANE))],
        out_specs=_full_spec((M, KD)),
        compiler_params=_ARB1,
    )(cols, prep['wc'], prep['bc'], prep['pool_mb'], prep['wf_t'], prep['wc_t'], g)


# ----------------------------- attack elementwise kernels -----------------------------

def _pgd_step_kernel(x_ref, g_ref, x0_ref, o_ref, *, step_size, epsilon):
    # x_adv = clamp(min(max(x + step*sign(g), x0-eps), x0+eps), -1, 1)
    xa = x_ref[...] + step_size * jnp.sign(g_ref[...])
    xa = jnp.minimum(jnp.maximum(xa, x0_ref[...] - epsilon), x0_ref[...] + epsilon)
    o_ref[...] = jnp.clip(xa, -1.0, 1.0)


def pgd_step_pallas(x, g, x0, step_size, epsilon):
    total = x.size
    assert total % LANE == 0
    rows = total // LANE                                 # lane-dense (rows, 128) view
    kern = functools.partial(_pgd_step_kernel, step_size=float(step_size),
                             epsilon=float(epsilon))
    out = pl.pallas_call(
        kern,
        out_shape=jax.ShapeDtypeStruct((rows, LANE), jnp.float32),
        grid=(1,),
        in_specs=[_full_spec((rows, LANE))] * 3,
        out_specs=_full_spec((rows, LANE)),
    )(x.reshape(rows, LANE), g.reshape(rows, LANE), x0.reshape(rows, LANE))
    return out.reshape(x.shape)


def _vertex_mix_kernel(x_ref, x0_ref, wx_ref, y_ref, wy_ref, xv_ref, yv_ref,
                       *, r, nc, ls1, ls2):
    x0 = x0_ref[...]
    xv = jnp.clip(x0 + (x_ref[...] - x0) * r, -1.0, 1.0)          # vertex point
    wx = wx_ref[...]                                              # (rows, 1)
    xv_ref[...] = x0 * wx + xv * (1.0 - wx)
    y = y_ref[...]
    y_org = y * (1.0 - ls1) + ls1 / nc                            # label_smoothing(ls_factor)
    y_vtx = y * (1.0 - ls2) + ls2 / nc                            # label_smoothing(ls_factor_2)
    wy = wy_ref[...]                                              # (B, 1)
    yv_ref[...] = y_org * wy + y_vtx * (1.0 - wy)


def vertex_mix_pallas(x, x_org, y_gt, weight, r, ls1, ls2):
    b = x.shape[0]
    total = x.size
    assert total % LANE == 0 and (total // LANE) % b == 0
    rows = total // LANE
    per_b = rows // b
    wx = jnp.repeat(weight, per_b).reshape(rows, 1)
    wy = weight.reshape(b, 1)
    nc = y_gt.shape[1]
    kern = functools.partial(_vertex_mix_kernel, r=float(r), nc=float(nc),
                             ls1=float(ls1), ls2=float(ls2))
    xv, yv = pl.pallas_call(
        kern,
        out_shape=(jax.ShapeDtypeStruct((rows, LANE), jnp.float32),
                   jax.ShapeDtypeStruct((b, nc), jnp.float32)),
        grid=(1,),
        in_specs=[_full_spec((rows, LANE)), _full_spec((rows, LANE)),
                  _full_spec((rows, 1)), _full_spec((b, nc)), _full_spec((b, 1))],
        out_specs=(_full_spec((rows, LANE)), _full_spec((b, nc))),
    )(x.reshape(rows, LANE), x_org.reshape(rows, LANE), wx, y_gt, wy)
    return xv.reshape(x.shape), yv


# ----------------------------- glue (plain JAX) -----------------------------

def im2col(x, k=K):
    # TODO(synk): at realistic H/W/C the im2col should move inside the Pallas
    # kernel (9 shifted matmuls); at 16x16 toy size the HBM cost is negligible.
    b, c, h, w = x.shape
    xp = jnp.pad(x, ((0, 0), (0, 0), (1, 1), (1, 1)))
    cols = []
    for kh in range(k):
        for kw in range(k):
            cols.append(xp[:, :, kh:kh + h, kw:kw + w])           # (B, C, H, W)
    p = jnp.stack(cols, axis=2)                                   # (B, C, K*K, H, W)
    return p.transpose(0, 3, 4, 1, 2).reshape(b * h * w, c * k * k)


def prep_net(params):
    """Precompute kernel-friendly weight layouts (lane-padded FC, pooling matrix)."""
    wc = params['wc']                                             # (KD, C_OUT)
    bc = params['bc']                                             # (1, C_OUT)
    wf_scaled = params['wf'] / float(HW)                          # fold 1/HW mean into FC
    wf_p = jnp.zeros((C_OUT, LANE), jnp.float32).at[:, :NUM_CLASSES].set(wf_scaled)
    bf_p = jnp.zeros((1, LANE), jnp.float32).at[:, :NUM_CLASSES].set(params['bf'])
    row_b = jnp.arange(M, dtype=jnp.int32) // HW                  # batch id of each row
    pool_bm = (row_b[None, :] == jnp.arange(B, dtype=jnp.int32)[:, None]).astype(jnp.float32)
    return dict(wc=wc, bc=bc, wf_p=wf_p, bf_p=bf_p,
                wc_t=wc.T, wf_t=wf_p.T, pool_bm=pool_bm, pool_mb=pool_bm.T)


def net_infer(prep, x):
    """basic_net forward (fused Pallas kernel). Returns (logits, softmax probs)."""
    cols = im2col(x)
    logits_p, probs_p = fused_net_forward(cols, prep)
    return logits_p[:, :NUM_CLASSES], probs_p[:, :NUM_CLASSES]


def make_diff_net(prep):
    """Differentiable net forward: custom_vjp whose fwd AND bwd are Pallas kernels.

    prep holds concrete weight arrays (only dL/dx is needed by the attack)."""

    @jax.custom_vjp
    def core(cols):
        logits_p, _ = fused_net_forward(cols, prep)
        return logits_p

    def core_fwd(cols):
        logits_p, _ = fused_net_forward(cols, prep)
        return logits_p, cols

    def core_bwd(cols, g):
        return (fused_net_backward(cols, g, prep),)

    core.defvjp(core_fwd, core_bwd)

    def net_logits(x):
        cols = im2col(x)                       # im2col transpose (col2im) handled by autodiff
        return core(cols)[:, :NUM_CLASSES]

    return net_logits


def sinkhorn_loss_ipot(logits_nat, logits_adv, reg=0.01, n_iter=30):
    # TODO(synk): differentiable Sinkhorn surrogate for ot.sinkhorn_loss_joint_IPOT
    # (external OT library; the exact joint-IPOT formulation is not reproduced).
    p = jax.nn.softmax(logits_nat, axis=-1)
    q = jax.nn.softmax(logits_adv, axis=-1)
    C = jnp.sum((p[:, None, :] - q[None, :, :]) ** 2, axis=-1)    # (m, n)
    m, n = C.shape
    a = jnp.full((m,), 1.0 / m, jnp.float32)
    b_ = jnp.full((n,), 1.0 / n, jnp.float32)
    Kmat = jnp.exp(-C / reg)

    def body(u, _):
        v = b_ / (Kmat.T @ u + 1e-9)
        return a / (Kmat @ v + 1e-9), None

    u, _ = lax.scan(body, a, None, length=n_iter)
    v = b_ / (Kmat.T @ u + 1e-9)
    T = u[:, None] * Kmat * v[None, :]
    return jnp.sum(T * C)


def init_params(key):
    kc, kf = jax.random.split(key)
    conv_w = jax.random.normal(kc, (C_OUT, C_IN, K, K), jnp.float32) * 0.1
    wc = conv_w.reshape(C_OUT, C_IN * K * K).T                    # (C_IN*K*K, C_OUT)
    bc = jnp.zeros((1, C_OUT), jnp.float32)
    wf = jax.random.normal(kf, (C_OUT, NUM_CLASSES), jnp.float32) * 0.1
    bf = jnp.zeros((1, NUM_CLASSES), jnp.float32)
    return dict(wc=wc, bc=bc, wf=wf, bf=bf)


def attack_vertex_forward(params, inputs, targets, key, config, attack=True,
                          attack_net=None):
    prep = prep_net(params)

    if not attack:
        logits, _probs = net_infer(prep, inputs)
        return logits, None, True, inputs, inputs

    box_type = config.get('box_type', 'white')
    if box_type == 'black':
        assert attack_net is not None, 'should provide an additional net in black-box case'
    # TODO(synk): aux_net is a pickle deep-copy of basic_net in the reference (weights are
    # shared here), and .train()/.eval() toggles have no compute content for this net.

    eps = config['epsilon']
    step = config['step_size']
    num_steps = config['num_steps']
    r = config['r']
    ls1 = config.get('ls_factor', 0.1)
    ls2 = config.get('ls_factor_2', 0.0)
    a1 = config.get('alpha1', 1.0)
    a2 = config.get('alpha2', 1.0)
    bsz = inputs.shape[0]

    # Single fused forward reused for logits / targets_prob / logits_pred_nat
    # (the reference runs aux_net(inputs) three times with identical results).
    logits_nat, targets_prob = net_infer(prep, inputs)
    num_classes = logits_nat.shape[1]
    y_gt = jax.nn.one_hot(targets, num_classes, dtype=jnp.float32)

    x_org = inputs
    k_noise, k_beta = jax.random.split(key)
    # Reference applies the uniform(-eps, eps) start unconditionally
    # (config['random_start'] is stored but never consulted in forward()).
    x = inputs + jax.random.uniform(k_noise, inputs.shape, inputs.dtype, -eps, eps)

    net_logits = make_diff_net(prep)
    logits_pred_nat = lax.stop_gradient(logits_nat)

    def adv_loss(xx):
        return sinkhorn_loss_ipot(logits_pred_nat, net_logits(xx))

    grad_fn = jax.grad(adv_loss)

    def pgd_body(_, x_cur):
        g = grad_fn(x_cur)                                   # Pallas fwd + Pallas bwd
        return pgd_step_pallas(x_cur, g, inputs, step, eps)  # fused PGD step

    x = lax.fori_loop(0, num_steps, pgd_body, x)

    # np.random.beta on CUDA -> deterministic jax.random.beta
    weight = jax.random.beta(k_beta, a1, a2, (bsz,)).astype(jnp.float32)

    # one launch for the whole vertex phase (x mix + label-smoothed y mix)
    x_vertex, y_vertex = vertex_mix_pallas(x, x_org, y_gt, weight, r, ls1, ls2)

    logits_pert, _ = net_infer(prep, x_vertex)
    return logits_pert, targets_prob, True, x, x_org, y_vertex


# ----------------------------- reference (for a sanity check) -----------------------------

def _net_logits_ref(params, x):
    cols = im2col(x)
    pre = jnp.dot(cols.astype(jnp.bfloat16), params['wc'].astype(jnp.bfloat16),
                  preferred_element_type=jnp.float32) + params['bc']
    conv = jnp.maximum(pre, 0.0)
    fea = jnp.mean(conv.reshape(B, HW, C_OUT), axis=1)
    return fea @ params['wf'] + params['bf']


if __name__ == "__main__":
    key = jax.random.PRNGKey(0)
    kp, kx, kt, ka = jax.random.split(key, 4)
    params = init_params(kp)
    inputs = jax.random.uniform(kx, (B, C_IN, H, W), jnp.float32, -1.0, 1.0)
    targets = jax.random.randint(kt, (B,), 0, NUM_CLASSES)

    # sanity check: fused Pallas forward vs. pure-JAX reference
    prep = prep_net(params)
    logits_k, probs_k = net_infer(prep, inputs)
    logits_r = _net_logits_ref(params, inputs)
    max_err = float(jnp.max(jnp.abs(logits_k - logits_r)))
    assert max_err < 5e-2, f"fused forward mismatch: {max_err}"

    out = attack_vertex_forward(params, inputs, targets, ka, CONFIG, attack=True)
    logits_pert, targets_prob, flag, x_adv, x_org, y_vertex = out
    jax.block_until_ready((logits_pert, targets_prob, x_adv, x_org, y_vertex))
    assert logits_pert.shape == (B, NUM_CLASSES)
    assert targets_prob.shape == (B, NUM_CLASSES)
    assert x_adv.shape == inputs.shape and x_org.shape == inputs.shape
    assert y_vertex.shape == (B, NUM_CLASSES)

    out_noattack = attack_vertex_forward(params, inputs, targets, ka, CONFIG, attack=False)
    jax.block_until_ready(out_noattack[0])
    assert out_noattack[0].shape == (B, NUM_CLASSES)

    print("KERNEL_OK")
</pallas_src>

<mosaic_0001>
module attributes {stable_mosaic.version = 11 : i64} {
  func.func @_net_fwd_kernel(%arg0: i32, %arg1: memref<512x36xf32, #tpu.memory_space<vmem>>, %arg2: memref<36x8xf32, #tpu.memory_space<vmem>>, %arg3: memref<1x8xf32, #tpu.memory_space<vmem>>, %arg4: memref<2x512xf32, #tpu.memory_space<vmem>>, %arg5: memref<8x128xf32, #tpu.memory_space<vmem>>, %arg6: memref<1x128xf32, #tpu.memory_space<vmem>>, %arg7: memref<2x128xf32, #tpu.memory_space<vmem>>, %arg8: memref<2x128xf32, #tpu.memory_space<vmem>>) attributes {dimension_semantics = [#tpu.dimension_semantics<arbitrary>], iteration_bounds = array<i64: 1>, scalar_prefetch = 0 : i64, scratch_operands = 0 : i64, tpu.core_type = #tpu.core_type<tc>, window_params = [{pipeline_mode = #tpu.pipeline_mode<synchronous>, transform_indices = @transform_0, window_bounds = array<i64: 512, 36>}, {pipeline_mode = #tpu.pipeline_mode<synchronous>, transform_indices = @transform_1, window_bounds = array<i64: 36, 8>}, {pipeline_mode = #tpu.pipeline_mode<synchronous>, transform_indices = @transform_2, window_bounds = array<i64: 1, 8>}, {pipeline_mode = #tpu.pipeline_mode<synchronous>, transform_indices = @transform_3, window_bounds = array<i64: 2, 512>}, {pipeline_mode = #tpu.pipeline_mode<synchronous>, transform_indices = @transform_4, window_bounds = array<i64: 8, 128>}, {pipeline_mode = #tpu.pipeline_mode<synchronous>, transform_indices = @transform_5, window_bounds = array<i64: 1, 128>}, {pipeline_mode = #tpu.pipeline_mode<synchronous>, transform_indices = @transform_6, window_bounds = array<i64: 2, 128>}, {pipeline_mode = #tpu.pipeline_mode<synchronous>, transform_indices = @transform_7, window_bounds = array<i64: 2, 128>}]} {
    %c0 = arith.constant 0 : index
    %c0_0 = arith.constant 0 : index
    %0 = vector.load %arg1[%c0, %c0_0] : memref<512x36xf32, #tpu.memory_space<vmem>>, vector<512x36xf32>
    %1 = arith.truncf %0 : vector<512x36xf32> to vector<512x36xbf16>
    %c0_1 = arith.constant 0 : index
    %c0_2 = arith.constant 0 : index
    %2 = vector.load %arg2[%c0_1, %c0_2] : memref<36x8xf32, #tpu.memory_space<vmem>>, vector<36x8xf32>
    %3 = arith.truncf %2 : vector<36x8xf32> to vector<36x8xbf16>
    %cst = arith.constant dense<0.000000e+00> : vector<512x8xf32>
    %4 = tpu.matmul %1, %3, %cst {dimension_numbers = #tpu.dot_dimension_numbers<[1], [0], [0], [1], [0, 0, 1, 1], [], []>} : vector<512x36xbf16>, vector<36x8xbf16>, vector<512x8xf32> -> vector<512x8xf32>
    %c0_3 = arith.constant 0 : index
    %c0_4 = arith.constant 0 : index
    %5 = vector.load %arg3[%c0_3, %c0_4] : memref<1x8xf32, #tpu.memory_space<vmem>>, vector<1x8xf32>
    %6 = vector.broadcast %5 : vector<1x8xf32> to vector<512x8xf32>
    %7 = arith.addf %4, %6 : vector<512x8xf32>
    %cst_5 = arith.constant 0.000000e+00 : f32
    %8 = vector.broadcast %cst_5 : f32 to vector<512x8xf32>
    %9 = arith.maximumf %7, %8 : vector<512x8xf32>
    %c0_6 = arith.constant 0 : index
    %c0_7 = arith.constant 0 : index
    %10 = vector.load %arg4[%c0_6, %c0_7] : memref<2x512xf32, #tpu.memory_space<vmem>>, vector<2x512xf32>
    %cst_8 = arith.constant dense<0.000000e+00> : vector<2x8xf32>
    %11 = tpu.matmul %10, %9, %cst_8 {dimension_numbers = #tpu.dot_dimension_numbers<[1], [0], [0], [1], [0, 0, 1, 1], [], []>} : vector<2x512xf32>, vector<512x8xf32>, vector<2x8xf32> -> vector<2x8xf32>
    %c0_9 = arith.constant 0 : index
    %c0_10 = arith.constant 0 : index
    %12 = vector.load %arg5[%c0_9, %c0_10] : memref<8x128xf32, #tpu.memory_space<vmem>>, vector<8x128xf32>
    %cst_11 = arith.constant dense<0.000000e+00> : vector<2x128xf32>
    %13 = tpu.matmul %11, %12, %cst_11 {dimension_numbers = #tpu.dot_dimension_numbers<[1], [0], [0], [1], [0, 0, 1, 1], [], []>} : vector<2x8xf32>, vector<8x128xf32>, vector<2x128xf32> -> vector<2x128xf32>
    %c0_12 = arith.constant 0 : index
    %c0_13 = arith.constant 0 : index
    %14 = vector.load %arg6[%c0_12, %c0_13] : memref<1x128xf32, #tpu.memory_space<vmem>>, vector<1x128xf32>
    %15 = vector.broadcast %14 : vector<1x128xf32> to vector<2x128xf32>
    %16 = arith.addf %13, %15 : vector<2x128xf32>
    %c0_14 = arith.constant 0 : index
    %c0_15 = arith.constant 0 : index
    %17 = vector.load %arg7[%c0_14, %c0_15] : memref<2x128xf32, #tpu.memory_space<vmem>>, vector<2x128xf32>
    tpu.vector_store %arg7[%c0_14, %c0_15], %16 {strides = array<i32>} : memref<2x128xf32, #tpu.memory_space<vmem>>, vector<2x128xf32>,
    %18 = tpu.iota {dimensions = array<i32: 1>} : vector<2x128xi32>
    %c10_i32 = arith.constant 10 : i32
    %19 = vector.broadcast %c10_i32 : i32 to vector<2x128xi32>
    %20 = arith.cmpi slt, %18, %19 : vector<2x128xi32>
    %cst_16 = arith.constant 0xFF800000 : f32
    %21 = vector.broadcast %cst_16 : f32 to vector<2x128xf32>
    %22 = arith.select %20, %16, %21 : vector<2x128xi1>, vector<2x128xf32>
    %cst_17 = arith.constant dense<0xFF800000> : vector<2xf32>
    %23 = vector.multi_reduction <maximumf>, %22, %cst_17 [1] : vector<2x128xf32> to vector<2xf32>
    %24 = vector.shape_cast %23 : vector<2xf32> to vector<2x1xf32>
    %25 = vector.broadcast %24 : vector<2x1xf32> to vector<2x128xf32>
    %26 = arith.subf %16, %25 : vector<2x128xf32>
    %27 = math.exp %26 : vector<2x128xf32>
    %cst_18 = arith.constant 0.000000e+00 : f32
    %28 = vector.broadcast %cst_18 : f32 to vector<2x128xf32>
    %29 = arith.select %20, %27, %28 : vector<2x128xi1>, vector<2x128xf32>
    %cst_19 = arith.constant dense<0.000000e+00> : vector<2xf32>
    %30 = vector.multi_reduction <add>, %29, %cst_19 [1] : vector<2x128xf32> to vector<2xf32>
    %31 = vector.shape_cast %30 : vector<2xf32> to vector<2x1xf32>
    %32 = tpu.reciprocal %31 {approx = true} : vector<2x1xf32> -> vector<2x1xf32>
    %33 = vector.broadcast %32 : vector<2x1xf32> to vector<2x128xf32>
    %34 = arith.mulf %29, %33 : vector<2x128xf32>
    %c0_20 = arith.constant 0 : index
    %c0_21 = arith.constant 0 : index
    %35 = vector.load %arg8[%c0_20, %c0_21] : memref<2x128xf32, #tpu.memory_space<vmem>>, vector<2x128xf32>
    tpu.vector_store %arg8[%c0_20, %c0_21], %34 {strides = array<i32>} : memref<2x128xf32, #tpu.memory_space<vmem>>, vector<2x128xf32>,
    return
  }
  func.func @transform_0(%arg0: i32) -> (i32, i32) {
    %c0_i32 = arith.constant 0 : i32
    %c0_i32_0 = arith.constant 0 : i32
    %c0_i32_1 = arith.constant 0 : i32
    return %c0_i32, %c0_i32_0 : i32, i32
  }
  func.func @transform_1(%arg0: i32) -> (i32, i32) {
    %c0_i32 = arith.constant 0 : i32
    %c0_i32_0 = arith.constant 0 : i32
    %c0_i32_1 = arith.constant 0 : i32
    return %c0_i32, %c0_i32_0 : i32, i32
  }
  func.func @transform_2(%arg0: i32) -> (i32, i32) {
    %c0_i32 = arith.constant 0 : i32
    %c0_i32_0 = arith.constant 0 : i32
    %c0_i32_1 = arith.constant 0 : i32
    return %c0_i32, %c0_i32_0 : i32, i32
  }
  func.func @transform_3(%arg0: i32) -> (i32, i32) {
    %c0_i32 = arith.constant 0 : i32
    %c0_i32_0 = arith.constant 0 : i32
    %c0_i32_1 = arith.constant 0 : i32
    return %c0_i32, %c0_i32_0 : i32, i32
  }
  func.func @transform_4(%arg0: i32) -> (i32, i32) {
    %c0_i32 = arith.constant 0 : i32
    %c0_i32_0 = arith.constant 0 : i32
    %c0_i32_1 = arith.constant 0 : i32
    return %c0_i32, %c0_i32_0 : i32, i32
  }
  func.func @transform_5(%arg0: i32) -> (i32, i32) {
    %c0_i32 = arith.constant 0 : i32
    %c0_i32_0 = arith.constant 0 : i32
    %c0_i32_1 = arith.constant 0 : i32
    return %c0_i32, %c0_i32_0 : i32, i32
  }
  func.func @transform_6(%arg0: i32) -> (i32, i32) {
    %c0_i32 = arith.constant 0 : i32
    %c0_i32_0 = arith.constant 0 : i32
    %c0_i32_1 = arith.constant 0 : i32
    return %c0_i32, %c0_i32_0 : i32, i32
  }
  func.func @transform_7(%arg0: i32) -> (i32, i32) {
    %c0_i32 = arith.constant 0 : i32
    %c0_i32_0 = arith.constant 0 : i32
    %c0_i32_1 = arith.constant 0 : i32
    return %c0_i32, %c0_i32_0 : i32, i32
  }
}

</mosaic_0001>

<bundles_post_ra>
// kernel: tpu_custom_call.1
= control target key start
LH: loop header
LB: loop body
LE: loop exit
PB: predicated region body
PF: predicated region fallthrough
CT: control target
= control target key end

     0   :  { %13 = vsyncpa [#allocation3], 0  ;;  %vm139_vm0 = vcmask 293888   ;;  %vm236_vm1 = vcmask 1041408   ;;  %s1688_s0 = inlined_call_operand.vmem [shape: f32[512,36], index: 0, kind: input, shape index: {}]   ;;  %s1689_s1 = inlined_call_operand.vmem [shape: f32[36,8], index: 1, kind: input, shape index: {}]   ;;  %s1690_s2 = inlined_call_operand.vmem [shape: f32[1,8], index: 2, kind: input, shape index: {}]   ;;  %s1691_s3 = inlined_call_operand.vmem [shape: f32[2,512], index: 3, kind: input, shape index: {}]   ;;  %s1692_s4 = inlined_call_operand.vmem [shape: f32[8,128], index: 4, kind: input, shape index: {}]   ;;  %s1693_s5 = inlined_call_operand.vmem [shape: f32[1,128], index: 5, kind: input, shape index: {}]   ;;  %s1694_s6 = inlined_call_operand.hbm [shape: f32[2,128], index: 6, kind: output, shape index: {0}]   ;;  %s1695_s7 = inlined_call_operand.hbm [shape: f32[2,128], index: 7, kind: output, shape index: {1}]  }
   0x1   :  { %v124_v0 = vld [vmem:[%s1689_s1] sm:$0xff]  ;;  %v125_v1 = vld [vmem:[%s1689_s1 + $0x8] sm:$0xff]  ;;  %v126_v2 = vld [vmem:[%s1689_s1 + $0x10] sm:$0xff] }
   0x2   :  { %v129_v3 = vpack.c.bf16 %v125_v1, %v124_v0  ;;  %v127_v4 = vld [vmem:[%s1689_s1 + $0x18] sm:$0xff]  ;;  %v28_v5 = vld [vmem:[%s1688_s0] sm:$0xff]  ;;  %v29_v8 = vld [vmem:[%s1688_s0 + $0x8] sm:$0xff] }
   0x3   :  { %v130_v6 = vpack.c.bf16 %v127_v4, %v126_v2  ;;  %v128_v7 = vld [vmem:[%s1689_s1 + $0x20] sm:$0xf]  ;;  %v92_v9 = vpack.c.bf16 %v29_v8, %v28_v5  ;;  %v30_v11 = vld [vmem:[%s1688_s0 + $0x10] sm:$0xff]  ;;  %v31_v12 = vld [vmem:[%s1688_s0 + $0x18] sm:$0xff] }
   0x4   :  { %1026 = vmatprep.subr.bf16.mxu0 %v129_v3  ;;  %1165 = vmatprep.subr.bf16.mxu1 %v129_v3  ;;  %v131_v10 = vpack.c.bf16 %v128_v7, %v128_v7  ;;  %v32_v14 = vld [vmem:[%s1688_s0 + $0x20] sm:$0xff]  ;;  %v33_v15 = vld [vmem:[%s1688_s0 + $0x28] sm:$0xff]  ;;  %v93_v16 = vpack.c.bf16 %v31_v12, %v30_v11  ;;  %v74_v21 = vld [vmem:[%s1688_s0 + $0x170] sm:$0xff] }
   0x5   :  { %1027 = vmatpush3.bf16.msra.mxu0 %v129_v3  ;;  %1168 = vmatpush3.bf16.msra.mxu1 %v129_v3  ;;  %v72_v17 = vld [vmem:[%s1688_s0 + $0x160] sm:$0xff]  ;;  %v94_v18 = vpack.c.bf16 %v33_v15, %v32_v14  ;;  %v73_v19 = vld [vmem:[%s1688_s0 + $0x168] sm:$0xff]  ;;  %v75_v22 = vld [vmem:[%s1688_s0 + $0x178] sm:$0xff] }
   0x6   :  { %1028 = vmatprep.subr.bf16.mxu0 %v130_v6  ;;  %1032 = vmatprep.mubr.msk.bf16.mxu0 %vm139_vm0, %v92_v9  ;;  %v238_v13 = vsel %vm236_vm1, %v131_v10, 0  ;;  %v114_v20 = vpack.c.bf16 %v73_v19, %v72_v17  ;;  %v76_v23 = vld [vmem:[%s1688_s0 + $0x180] sm:$0xff]  ;;  %v115_v24 = vpack.c.bf16 %v75_v22, %v74_v21  ;;  %v77_v25 = vld [vmem:[%s1688_s0 + $0x188] sm:$0xff]  ;;  %v34_v27 = vld [vmem:[%s1688_s0 + $0x30] sm:$0xff] }
   0x7   :  { %1166 = vmatprep.subr.bf16.mxu1 %v130_v6  ;;  %v116_v26 = vpack.c.bf16 %v77_v25, %v76_v23  ;;  %v35_v28 = vld [vmem:[%s1688_s0 + $0x38] sm:$0xff]  ;;  %v36_v29 = vld [vmem:[%s1688_s0 + $0x40] sm:$0xff]  ;;  %v37_v30 = vld [vmem:[%s1688_s0 + $0x48] sm:$0xff] }
   0x8   :  { %1076 = vmatprep.mubr.msk.bf16.mxu1 %vm139_vm0, %v114_v20  ;;  %v78_v31 = vld [vmem:[%s1688_s0 + $0x190] sm:$0xff]  ;;  %v79_v32 = vld [vmem:[%s1688_s0 + $0x198] sm:$0xff]  ;;  %v80_v33 = vld [vmem:[%s1688_s0 + $0x1a0] sm:$0xff]  ;;  %v95_v35 = vpack.c.bf16 %v35_v28, %v34_v27  ;;  %v96_v36 = vpack.c.bf16 %v37_v30, %v36_v29 }
   0x9   :  { %1029 = vmatpush3.bf16.msra.mxu0 %v130_v6  ;;  %1169 = vmatpush3.bf16.msra.mxu1 %v130_v6  ;;  %v81_v34 = vld [vmem:[%s1688_s0 + $0x1a8] sm:$0xff]  ;;  %v117_v37 = vpack.c.bf16 %v79_v32, %v78_v31 }
   0xa   :  { %1171 = vmatprep.subr.msk.bf16.mxu0 %vm236_vm1, %v131_v10  ;;  %1172 = vmatprep.subr.msk.bf16.mxu1 %vm236_vm1, %v131_v10  ;;  %v118_v38 = vpack.c.bf16 %v81_v34, %v80_v33 }
   0xd   :  { %1031 = vmatpush3.bf16.msra.mxu0 %v238_v13  ;;  %1170 = vmatpush3.bf16.msra.mxu1 %v238_v13 }
  0x10   :  { %1033 = vmatmul.mubr.msk.bf16.vlgmr.msra.gmra.mrb[0].mxu0 %vm139_vm0, %v93_v16  ;;  %1077 = vmatmul.mubr.msk.bf16.vlgmr.msra.gmra.mrb[0].mxu1 %vm139_vm0, %v115_v24 }
  0x11   :  { %1036 = vmatprep.mubr.msk.bf16.mxu0 %vm139_vm0, %v94_v18  ;;  %1080 = vmatprep.mubr.msk.bf16.mxu1 %vm139_vm0, %v116_v26 }
  0x18   :  { %1037 = vmatmul.mubr.msk.bf16.gmra.mrb[4].mxu0 %vm139_vm0, %v95_v35 }
  0x19   :  { %14 = vsyncpa [#allocation5], 0  ;;  %1040 = vmatprep.mubr.msk.bf16.mxu0 %vm139_vm0, %v96_v36  ;;  %v38_v39 = vld [vmem:[%s1688_s0 + $0x50] sm:$0xff]  ;;  %v39_v40 = vld [vmem:[%s1688_s0 + $0x58] sm:$0xff]  ;;  %1081 = vmatmul.mubr.msk.bf16.gmra.mrb[4].mxu1 %vm139_vm0, %v117_v37  ;;  %vm1233_vm2 = vmmov 0   ;;  %vm764_vm3 = vcmask 64512  }
  0x1a   :  { %v40_v41 = vld [vmem:[%s1688_s0 + $0x60] sm:$0xff]  ;;  %v41_v42 = vld [vmem:[%s1688_s0 + $0x68] sm:$0xff]  ;;  %1084 = vmatprep.mubr.msk.bf16.mxu1 %vm139_vm0, %v118_v38  ;;  %v82_v43 = vld [vmem:[%s1688_s0 + $0x1b0] sm:$0xff]  ;;  %v97_v47 = vpack.c.bf16 %v39_v40, %v38_v39 }
  0x1b   :  { %v83_v44 = vld [vmem:[%s1688_s0 + $0x1b8] sm:$0xff]  ;;  %v84_v45 = vld [vmem:[%s1688_s0 + $0x1c0] sm:$0xff]  ;;  %v85_v46 = vld [vmem:[%s1688_s0 + $0x1c8] sm:$0xff]  ;;  %v98_v48 = vpack.c.bf16 %v41_v42, %v40_v41  ;;  %v1231_v41 = vmov 1983009808  }
  0x1c   :  { %v119_v49 = vpack.c.bf16 %v83_v44, %v82_v43  ;;  %v120_v50 = vpack.c.bf16 %v85_v46, %v84_v45  ;;  %v42_v51 = vld [vmem:[%s1688_s0 + $0x70] sm:$0xff]  ;;  %v43_v52 = vld [vmem:[%s1688_s0 + $0x78] sm:$0xff]  ;;  %v44_v53 = vld [vmem:[%s1688_s0 + $0x80] sm:$0xff]  ;;  %v597_v42 = vunpack.c.l.s4 %v1231_v41  ;;  %v599_v43 = vlaneseq }
  0x1d   :  { %v45_v54 = vld [vmem:[%s1688_s0 + $0x88] sm:$0xff]  ;;  %v86_v55 = vld [vmem:[%s1688_s0 + $0x1d0] sm:$0xff]  ;;  %v87_v56 = vld [vmem:[%s1688_s0 + $0x1d8] sm:$0xff]  ;;  %v99_v59 = vpack.c.bf16 %v43_v52, %v42_v51 }
  0x1e   :  { %v88_v57 = vld [vmem:[%s1688_s0 + $0x1e0] sm:$0xff]  ;;  %v89_v58 = vld [vmem:[%s1688_s0 + $0x1e8] sm:$0xff]  ;;  %v100_v60 = vpack.c.bf16 %v45_v54, %v44_v53  ;;  %v121_v61 = vpack.c.bf16 %v87_v56, %v86_v55  ;;  %v46_v63 = vld [vmem:[%s1688_s0 + $0x90] sm:$0xff]  ;;  %v598_v44 = vunpack.c.0.s8 %v597_v42  ;;  %v600_v45 = vshrl.u32 %v599_v43, 7 }
  0x1f   :  { %v122_v62 = vpack.c.bf16 %v89_v58, %v88_v57  ;;  %v47_v0 = vld [vmem:[%s1688_s0 + $0x98] sm:$0xff]  ;;  %v48_v1 = vld [vmem:[%s1688_s0 + $0xa0] sm:$0xff]  ;;  %v49_v2 = vld [vmem:[%s1688_s0 + $0xa8] sm:$0xff] }
  0x20   :  { %1041 = vmatmul.mubr.msk.bf16.gmra.mrb[8].mxu0 %vm139_vm0, %v97_v47  ;;  %v90_v3 = vld [vmem:[%s1688_s0 + $0x1f0] sm:$0xff]  ;;  %v91_v4 = vld [vmem:[%s1688_s0 + $0x1f8] sm:$0xff]  ;;  %v101_v5 = vpack.c.bf16 %v47_v0, %v46_v63  ;;  %v102_v6 = vpack.c.bf16 %v49_v2, %v48_v1  ;;  %v52_v10 = vld [vmem:[%s1688_s0 + $0xc0] sm:$0xff]  ;;  %v601_v46 = vsub.s32 %v598_v44, %v600_v45 }
  0x21   :  { %1044 = vmatprep.mubr.msk.bf16.mxu0 %vm139_vm0, %v98_v48  ;;  %1085 = vmatmul.mubr.msk.bf16.gmra.mrb[8].mxu1 %vm139_vm0, %v119_v49  ;;  %v123_v7 = vpack.c.bf16 %v91_v4, %v90_v3  ;;  %v50_v8 = vld [vmem:[%s1688_s0 + $0xb0] sm:$0xff]  ;;  %v51_v9 = vld [vmem:[%s1688_s0 + $0xb8] sm:$0xff]  ;;  %v53_v11 = vld [vmem:[%s1688_s0 + $0xc8] sm:$0xff] }
  0x22   :  { %1088 = vmatprep.mubr.msk.bf16.mxu1 %vm139_vm0, %v120_v50  ;;  %v103_v12 = vpack.c.bf16 %v51_v9, %v50_v8  ;;  %v104_v13 = vpack.c.bf16 %v53_v11, %v52_v10  ;;  %v54_v14 = vld [vmem:[%s1688_s0 + $0xd0] sm:$0xff]  ;;  %v55_v15 = vld [vmem:[%s1688_s0 + $0xd8] sm:$0xff]  ;;  %v56_v16 = vld [vmem:[%s1688_s0 + $0xe0] sm:$0xff] }
  0x23   :  { %v57_v17 = vld [vmem:[%s1688_s0 + $0xe8] sm:$0xff]  ;;  %v105_v18 = vpack.c.bf16 %v55_v15, %v54_v14  ;;  %v58_v20 = vld [vmem:[%s1688_s0 + $0xf0] sm:$0xff]  ;;  %v59_v21 = vld [vmem:[%s1688_s0 + $0xf8] sm:$0xff] }
  0x24   :  { %v106_v19 = vpack.c.bf16 %v57_v17, %v56_v16  ;;  %v60_v22 = vld [vmem:[%s1688_s0 + $0x100] sm:$0xff]  ;;  %v61_v23 = vld [vmem:[%s1688_s0 + $0x108] sm:$0xff]  ;;  %v107_v24 = vpack.c.bf16 %v59_v21, %v58_v20  ;;  %v62_v26 = vld [vmem:[%s1688_s0 + $0x110] sm:$0xff] }
  0x25   :  { %v108_v25 = vpack.c.bf16 %v61_v23, %v60_v22  ;;  %v63_v27 = vld [vmem:[%s1688_s0 + $0x118] sm:$0xff]  ;;  %v64_v28 = vld [vmem:[%s1688_s0 + $0x120] sm:$0xff]  ;;  %v65_v29 = vld [vmem:[%s1688_s0 + $0x128] sm:$0xff] }
  0x26   :  { %v109_v30 = vpack.c.bf16 %v63_v27, %v62_v26  ;;  %v110_v31 = vpack.c.bf16 %v65_v29, %v64_v28  ;;  %v66_v32 = vld [vmem:[%s1688_s0 + $0x130] sm:$0xff]  ;;  %v67_v33 = vld [vmem:[%s1688_s0 + $0x138] sm:$0xff]  ;;  %v68_v34 = vld [vmem:[%s1688_s0 + $0x140] sm:$0xff] }
  0x27   :  { %v69_v35 = vld [vmem:[%s1688_s0 + $0x148] sm:$0xff]  ;;  %v111_v36 = vpack.c.bf16 %v67_v33, %v66_v32  ;;  %v70_v38 = vld [vmem:[%s1688_s0 + $0x150] sm:$0xff]  ;;  %v71_v39 = vld [vmem:[%s1688_s0 + $0x158] sm:$0xff] }
  0x28   :  { %1045 = vmatmul.mubr.msk.bf16.gmra.mrb[12].mxu0 %vm139_vm0, %v99_v59  ;;  %v112_v37 = vpack.c.bf16 %v69_v35, %v68_v34  ;;  %v113_v40 = vpack.c.bf16 %v71_v39, %v70_v38  ;;  %v593_v47 = vld [vmem:[%s1691_s3] sm:$0xff] }
  0x29   :  { %1048 = vmatprep.mubr.msk.bf16.mxu0 %vm139_vm0, %v100_v60  ;;  %1089 = vmatmul.mubr.msk.bf16.gmra.mrb[12].mxu1 %vm139_vm0, %v121_v61  ;;  %v1522_v48 = vrot.slane %v593_v47, %v601_v46  ;;  %v595_v50 = vcombine.high %v593_v47, %v593_v47  ;;  %v1531_v52 = vld [vmem:[%s1690_s2] ss:$0 sm:$0xff] }
  0x2a   :  { %1092 = vmatprep.mubr.msk.bf16.mxu1 %vm139_vm0, %v122_v62 }
  0x2b   :  { %v610_v49 = vcombine.high %v1522_v48, %v1522_v48  ;;  %v1526_v51 = vrot.slane %v595_v50, %v601_v46 }
  0x30   :  { %1049 = vmatmul.mubr.msk.bf16.gmra.mrb[16].mxu0 %vm139_vm0, %v101_v5 }
  0x31   :  { %1052 = vmatprep.mubr.msk.bf16.mxu0 %vm139_vm0, %v102_v6  ;;  %1093 = vmatmul.mubr.msk.bf16.gmra.mrb[16].mxu1 %vm139_vm0, %v123_v7 }
  0x32   :  { %680 = vmatprep.mubr.f32.mxu1 %v610_v49 }
  0x38   :  { %1053 = vmatmul.mubr.msk.bf16.gmra.mrb[20].mxu0 %vm139_vm0, %v103_v12 }
  0x39   :  { %1056 = vmatprep.mubr.msk.bf16.mxu0 %vm139_vm0, %v104_v13 }
  0x40   :  { %1057 = vmatmul.mubr.msk.bf16.gmra.mrb[24].mxu0 %vm139_vm0, %v105_v18 }
  0x41   :  { %1060 = vmatprep.mubr.msk.bf16.mxu0 %vm139_vm0, %v106_v19 }
  0x48   :  { %1061 = vmatmul.mubr.msk.bf16.gmra.mrb[28].mxu0 %vm139_vm0, %v107_v24 }
  0x49   :  { %1064 = vmatprep.mubr.msk.bf16.mxu0 %vm139_vm0, %v108_v25 }
  0x50   :  { %1065 = vmatmul.mubr.msk.bf16.gmra.mrb[32].mxu0 %vm139_vm0, %v109_v30 }
  0x51   :  { %1068 = vmatprep.mubr.msk.bf16.mxu0 %vm139_vm0, %v110_v31 }
  0x58   :  { %1069 = vmatmul.mubr.msk.bf16.gmra.mrb[36].mxu0 %vm139_vm0, %v111_v36 }
  0x59   :  { %1072 = vmatprep.mubr.msk.bf16.mxu0 %vm139_vm0, %v112_v37 }
  0x60   :  { %1073 = vmatmul.mubr.msk.bf16.gmra.mrb[40].mxu0 %vm139_vm0, %v113_v40 }
  0xe3   :  { %v1034_v53 = vpop.f32.mrb[0].mxu0  ;;  %v1078_v56 = vpop.f32.mrb[0].mxu1 }
  0xe4   :  { %v283_v54 = vadd.f32 %v1034_v53, %v1531_v52  ;;  %v274_v55 = vpop.f32.mrb[1].mxu0  ;;  %v459_v59 = vadd.f32 %v1078_v56, %v1531_v52  ;;  %v450_v60 = vpop.f32.mrb[1].mxu1 }
  0xe5   :  { %v275_v57 = vadd.f32 %v1531_v52, %v274_v55  ;;  %v1035_v58 = vpop.f32.mrb[2].mxu0  ;;  %v451_v63 = vadd.f32 %v1531_v52, %v450_v60  ;;  %v1079_v0 = vpop.f32.mrb[2].mxu1 }
  0xe6   :  { %v286_v61 = vadd.f32 %v1035_v58, %v1531_v52  ;;  %v277_v62 = vpop.f32.mrb[3].mxu0  ;;  %v575_v2 = vmax.f32 %v459_v59, 0.0  ;;  %v462_v3 = vadd.f32 %v1079_v0, %v1531_v52  ;;  %v453_v4 = vpop.f32.mrb[3].mxu1  ;;  %v531_v5 = vmax.f32 %v283_v54, 0.0 }
  0xe7   :  { %v278_v1 = vadd.f32 %v1531_v52, %v277_v62  ;;  %v573_v7 = vmax.f32 %v451_v63, 0.0  ;;  %v454_v8 = vadd.f32 %v1531_v52, %v453_v4  ;;  %v529_v9 = vmax.f32 %v275_v57, 0.0 }
  0xe8   :  { %v532_v6 = vmax.f32 %v286_v61, 0.0  ;;  %v576_v11 = vmax.f32 %v462_v3, 0.0 }
  0xe9   :  { %v530_v10 = vmax.f32 %v278_v1, 0.0  ;;  %v574_v13 = vmax.f32 %v454_v8, 0.0 }
  0xea   :  { %v1541_v12 = vpack.c.bf16 %v532_v6, %v531_v5  ;;  %v1545_v16 = vpack.c.bf16 %v576_v11, %v575_v2 }
  0xeb   :  { %v1543_v14 = vpack.c.bf16 %v530_v10, %v529_v9  ;;  %v1038_v15 = vpop.f32.mrb[4].mxu0  ;;  %v1548_v19 = vpack.c.bf16 %v574_v13, %v573_v7 }
  0xec   :  { %v299_v17 = vadd.f32 %v1038_v15, %v1531_v52  ;;  %v290_v18 = vpop.f32.mrb[5].mxu0  ;;  %v1082_v20 = vpop.f32.mrb[4].mxu1 }
  0xed   :  { %v291_v21 = vadd.f32 %v1531_v52, %v290_v18  ;;  %v1039_v22 = vpop.f32.mrb[6].mxu0  ;;  %v475_v23 = vadd.f32 %v1082_v20, %v1531_v52  ;;  %v466_v24 = vpop.f32.mrb[5].mxu1 }
  0xee   :  { %v302_v25 = vadd.f32 %v1039_v22, %v1531_v52  ;;  %v293_v26 = vpop.f32.mrb[7].mxu0  ;;  %v467_v27 = vadd.f32 %v1531_v52, %v466_v24  ;;  %v1083_v28 = vpop.f32.mrb[6].mxu1  ;;  %v535_v33 = vmax.f32 %v299_v17, 0.0 }
  0xef   :  { %v294_v29 = vadd.f32 %v1531_v52, %v293_v26  ;;  %v579_v30 = vmax.f32 %v475_v23, 0.0  ;;  %v478_v31 = vadd.f32 %v1083_v28, %v1531_v52  ;;  %v469_v32 = vpop.f32.mrb[7].mxu1  ;;  %v533_v37 = vmax.f32 %v291_v21, 0.0 }
  0xf0   :  { %v536_v34 = vmax.f32 %v302_v25, 0.0  ;;  %v577_v35 = vmax.f32 %v467_v27, 0.0  ;;  %v470_v36 = vadd.f32 %v1531_v52, %v469_v32 }
  0xf1   :  { %v534_v38 = vmax.f32 %v294_v29, 0.0  ;;  %v580_v39 = vmax.f32 %v478_v31, 0.0 }
  0xf2   :  { %v1557_v40 = vpack.c.bf16 %v536_v34, %v535_v33  ;;  %v578_v41 = vmax.f32 %v470_v36, 0.0 }
  0xf3   :  { %v1559_v42 = vpack.c.bf16 %v534_v38, %v533_v37  ;;  %v1042_v44 = vpop.f32.mrb[8].mxu0  ;;  %v1561_v45 = vpack.c.bf16 %v580_v39, %v579_v30 }
  0xf4   :  { %v315_v46 = vadd.f32 %v1042_v44, %v1531_v52  ;;  %v306_v47 = vpop.f32.mrb[9].mxu0  ;;  %v1564_v49 = vpack.c.bf16 %v578_v41, %v577_v35  ;;  %v1086_v50 = vpop.f32.mrb[8].mxu1 }
  0xf5   :  { %v307_v53 = vadd.f32 %v1531_v52, %v306_v47  ;;  %v1043_v54 = vpop.f32.mrb[10].mxu0  ;;  %v491_v55 = vadd.f32 %v1086_v50, %v1531_v52  ;;  %v482_v56 = vpop.f32.mrb[9].mxu1 }
  0xf6   :  { %v318_v57 = vadd.f32 %v1043_v54, %v1531_v52  ;;  %v309_v58 = vpop.f32.mrb[11].mxu0  ;;  %v483_v59 = vadd.f32 %v1531_v52, %v482_v56  ;;  %v1087_v60 = vpop.f32.mrb[10].mxu1  ;;  %v539_v1 = vmax.f32 %v315_v46, 0.0 }
  0xf7   :  { %v310_v61 = vadd.f32 %v1531_v52, %v309_v58  ;;  %v583_v62 = vmax.f32 %v491_v55, 0.0  ;;  %v494_v63 = vadd.f32 %v1087_v60, %v1531_v52  ;;  %v485_v0 = vpop.f32.mrb[11].mxu1  ;;  %v537_v5 = vmax.f32 %v307_v53, 0.0 }
  0xf8   :  { %v540_v2 = vmax.f32 %v318_v57, 0.0  ;;  %v581_v3 = vmax.f32 %v483_v59, 0.0  ;;  %v486_v4 = vadd.f32 %v1531_v52, %v485_v0 }
  0xf9   :  { %v538_v6 = vmax.f32 %v310_v61, 0.0  ;;  %v584_v7 = vmax.f32 %v494_v63, 0.0 }
  0xfa   :  { %v1573_v8 = vpack.c.bf16 %v540_v2, %v539_v1  ;;  %v582_v9 = vmax.f32 %v486_v4, 0.0 }
  0xfb   :  { %v1575_v10 = vpack.c.bf16 %v538_v6, %v537_v5  ;;  %v1046_v11 = vpop.f32.mrb[12].mxu0  ;;  %v1577_v13 = vpack.c.bf16 %v584_v7, %v583_v62 }
  0xfc   :  { %v331_v15 = vadd.f32 %v1046_v11, %v1531_v52  ;;  %v322_v17 = vpop.f32.mrb[13].mxu0  ;;  %v1580_v18 = vpack.c.bf16 %v582_v9, %v581_v3  ;;  %v1090_v20 = vpop.f32.mrb[12].mxu1 }
  0xfd   :  { %v323_v21 = vadd.f32 %v1531_v52, %v322_v17  ;;  %v1047_v22 = vpop.f32.mrb[14].mxu0  ;;  %v507_v23 = vadd.f32 %v1090_v20, %v1531_v52  ;;  %v498_v24 = vpop.f32.mrb[13].mxu1 }
  0xfe   :  { %v334_v25 = vadd.f32 %v1047_v22, %v1531_v52  ;;  %v325_v26 = vpop.f32.mrb[15].mxu0  ;;  %v499_v27 = vadd.f32 %v1531_v52, %v498_v24  ;;  %v1091_v28 = vpop.f32.mrb[14].mxu1  ;;  %v543_v33 = vmax.f32 %v331_v15, 0.0 }
  0xff   :  { %v326_v29 = vadd.f32 %v1531_v52, %v325_v26  ;;  %v587_v30 = vmax.f32 %v507_v23, 0.0  ;;  %v510_v31 = vadd.f32 %v1091_v28, %v1531_v52  ;;  %v501_v32 = vpop.f32.mrb[15].mxu1  ;;  %v541_v37 = vmax.f32 %v323_v21, 0.0 }
 0x100   :  { %v544_v34 = vmax.f32 %v334_v25, 0.0  ;;  %v585_v35 = vmax.f32 %v499_v27, 0.0  ;;  %v502_v36 = vadd.f32 %v1531_v52, %v501_v32 }
 0x101   :  { %v542_v38 = vmax.f32 %v326_v29, 0.0  ;;  %v588_v39 = vmax.f32 %v510_v31, 0.0 }
 0x102   :  { %v1589_v41 = vpack.c.bf16 %v544_v34, %v543_v33  ;;  %v586_v44 = vmax.f32 %v502_v36, 0.0 }
 0x103   :  { %v1591_v46 = vpack.c.bf16 %v542_v38, %v541_v37  ;;  %v1050_v47 = vpop.f32.mrb[16].mxu0  ;;  %v1593_v50 = vpack.c.bf16 %v588_v39, %v587_v30 }
 0x104   :  { %v347_v53 = vadd.f32 %v1050_v47, %v1531_v52  ;;  %v338_v54 = vpop.f32.mrb[17].mxu0  ;;  %v1596_v55 = vpack.c.bf16 %v586_v44, %v585_v35  ;;  %v1094_v56 = vpop.f32.mrb[16].mxu1 }
 0x105   :  { %v339_v57 = vadd.f32 %v1531_v52, %v338_v54  ;;  %v1051_v58 = vpop.f32.mrb[18].mxu0  ;;  %v523_v59 = vadd.f32 %v1094_v56, %v1531_v52  ;;  %v514_v60 = vpop.f32.mrb[17].mxu1 }
 0x106   :  { %v350_v61 = vadd.f32 %v1051_v58, %v1531_v52  ;;  %v341_v62 = vpop.f32.mrb[19].mxu0  ;;  %v515_v63 = vadd.f32 %v1531_v52, %v514_v60  ;;  %v1095_v0 = vpop.f32.mrb[18].mxu1  ;;  %v547_v5 = vmax.f32 %v347_v53, 0.0 }
 0x107   :  { %v342_v1 = vadd.f32 %v1531_v52, %v341_v62  ;;  %v591_v2 = vmax.f32 %v523_v59, 0.0  ;;  %v526_v3 = vadd.f32 %v1095_v0, %v1531_v52  ;;  %v517_v4 = vpop.f32.mrb[19].mxu1  ;;  %v545_v11 = vmax.f32 %v339_v57, 0.0 }
 0x108   :  { %v548_v6 = vmax.f32 %v350_v61, 0.0  ;;  %v589_v7 = vmax.f32 %v515_v63, 0.0  ;;  %v518_v9 = vadd.f32 %v1531_v52, %v517_v4 }
 0x109   :  { %v546_v15 = vmax.f32 %v342_v1, 0.0  ;;  %v592_v17 = vmax.f32 %v526_v3, 0.0 }
 0x10a   :  { %v1105_v20 = vpack.c.bf16 %v548_v6, %v547_v5  ;;  %v590_v21 = vmax.f32 %v518_v9, 0.0 }
 0x10b   :  { %v1101_v22 = vpack.c.bf16 %v546_v15, %v545_v11  ;;  %v1054_v23 = vpop.f32.mrb[20].mxu0  ;;  %v1605_v24 = vpack.c.bf16 %v592_v17, %v591_v2 }
 0x10c   :  { %v363_v25 = vadd.f32 %v1054_v23, %v1531_v52  ;;  %v354_v26 = vpop.f32.mrb[21].mxu0  ;;  %v1608_v27 = vpack.c.bf16 %v590_v21, %v589_v7 }
 0x10d   :  { %v355_v28 = vadd.f32 %v1531_v52, %v354_v26  ;;  %v1055_v29 = vpop.f32.mrb[22].mxu0  ;;  %1102 = vmatprep.subr.bf16.mxu1 %v1101_v22 }
 0x10e   :  { %v366_v30 = vadd.f32 %v1055_v29, %v1531_v52  ;;  %v357_v31 = vpop.f32.mrb[23].mxu0  ;;  %1104 = vmatpush3.bf16.msra.mxu1 %v1543_v14  ;;  %v551_v33 = vmax.f32 %v363_v25, 0.0 }
 0x10f   :  { %v358_v32 = vadd.f32 %v1531_v52, %v357_v31  ;;  %1106 = vmatprep.subr.bf16.mxu1 %v1105_v20  ;;  %v549_v35 = vmax.f32 %v355_v28, 0.0 }
 0x110   :  { %v552_v34 = vmax.f32 %v366_v30, 0.0 }
 0x111   :  { %v550_v36 = vmax.f32 %v358_v32, 0.0  ;;  %v611_v32 = vcombine.high %v1526_v51, %v1526_v51 }
 0x112   :  { %v1113_v37 = vpack.c.bf16 %v552_v34, %v551_v33  ;;  %1108 = vmatpush3.bf16.msra.mxu1 %v1541_v12 }
 0x113   :  { %v1109_v38 = vpack.c.bf16 %v550_v36, %v549_v35  ;;  %v1058_v39 = vpop.f32.mrb[24].mxu0 }
 0x114   :  { %v379_v44 = vadd.f32 %v1058_v39, %v1531_v52  ;;  %v370_v47 = vpop.f32.mrb[25].mxu0 }
 0x115   :  { %v371_v53 = vadd.f32 %v1531_v52, %v370_v47  ;;  %v1059_v54 = vpop.f32.mrb[26].mxu0  ;;  %1110 = vmatprep.subr.bf16.mxu1 %v1109_v38 }
 0x116   :  { %v382_v14 = vadd.f32 %v1059_v54, %v1531_v52  ;;  %v373_v56 = vpop.f32.mrb[27].mxu0  ;;  %1112 = vmatpush3.bf16.msra.mxu1 %v1559_v42  ;;  %v555_v58 = vmax.f32 %v379_v44, 0.0 }
 0x117   :  { %v374_v57 = vadd.f32 %v1531_v52, %v373_v56  ;;  %1114 = vmatprep.subr.bf16.mxu1 %v1113_v37  ;;  %v553_v12 = vmax.f32 %v371_v53, 0.0 }
 0x118   :  { %v556_v59 = vmax.f32 %v382_v14, 0.0 }
 0x119   :  { %v554_v60 = vmax.f32 %v374_v57, 0.0 }
 0x11a   :  { %v1121_v61 = vpack.c.bf16 %v556_v59, %v555_v58  ;;  %1116 = vmatpush3.bf16.msra.mxu1 %v1557_v40 }
 0x11b   :  { %v1117_v62 = vpack.c.bf16 %v554_v60, %v553_v12  ;;  %v1062_v63 = vpop.f32.mrb[28].mxu0 }
 0x11c   :  { %v395_v0 = vadd.f32 %v1062_v63, %v1531_v52  ;;  %v386_v1 = vpop.f32.mrb[29].mxu0 }
 0x11d   :  { %v387_v2 = vadd.f32 %v1531_v52, %v386_v1  ;;  %v1063_v3 = vpop.f32.mrb[30].mxu0  ;;  %1118 = vmatprep.subr.bf16.mxu1 %v1117_v62 }
 0x11e   :  { %v398_v42 = vadd.f32 %v1063_v3, %v1531_v52  ;;  %v389_v4 = vpop.f32.mrb[31].mxu0  ;;  %1120 = vmatpush3.bf16.msra.mxu1 %v1575_v10  ;;  %v559_v6 = vmax.f32 %v395_v0, 0.0 }
 0x11f   :  { %v390_v5 = vadd.f32 %v1531_v52, %v389_v4  ;;  %1122 = vmatprep.subr.bf16.mxu1 %v1121_v61  ;;  %v557_v40 = vmax.f32 %v387_v2, 0.0 }
 0x120   :  { %v560_v7 = vmax.f32 %v398_v42, 0.0 }
 0x121   :  { %v558_v9 = vmax.f32 %v390_v5, 0.0 }
 0x122   :  { %v1129_v11 = vpack.c.bf16 %v560_v7, %v559_v6  ;;  %1124 = vmatpush3.bf16.msra.mxu1 %v1573_v8 }
 0x123   :  { %v1125_v15 = vpack.c.bf16 %v558_v9, %v557_v40  ;;  %v1066_v17 = vpop.f32.mrb[32].mxu0 }
 0x124   :  { %v411_v20 = vadd.f32 %v1066_v17, %v1531_v52  ;;  %v402_v21 = vpop.f32.mrb[33].mxu0 }
 0x125   :  { %v403_v22 = vadd.f32 %v1531_v52, %v402_v21  ;;  %1126 = vmatprep.subr.bf16.mxu1 %v1125_v15  ;;  %v1067_v23 = vpop.f32.mrb[34].mxu0 }
 0x126   :  { %v563_v10 = vmax.f32 %v411_v20, 0.0  ;;  %v414_v25 = vadd.f32 %v1067_v23, %v1531_v52  ;;  %1128 = vmatpush3.bf16.msra.mxu1 %v1591_v46  ;;  %v405_v26 = vpop.f32.mrb[35].mxu0 }
 0x127   :  { %v406_v28 = vadd.f32 %v1531_v52, %v405_v26  ;;  %1130 = vmatprep.subr.bf16.mxu1 %v1129_v11  ;;  %v561_v8 = vmax.f32 %v403_v22, 0.0 }
 0x128   :  { %v564_v29 = vmax.f32 %v414_v25, 0.0 }
 0x129   :  { %v562_v30 = vmax.f32 %v406_v28, 0.0 }
 0x12a   :  { %v1139_v31 = vpack.c.bf16 %v564_v29, %v563_v10  ;;  %1132 = vmatpush3.bf16.msra.mxu1 %v1589_v41 }
 0x12b   :  { %v1135_v33 = vpack.c.bf16 %v562_v30, %v561_v8  ;;  %v1070_v34 = vpop.f32.mrb[36].mxu0  ;;  %1134 = vmatprep.subr.bf16.mxu1 %v1564_v49 }
 0x12c   :  { %v427_v35 = vadd.f32 %v1070_v34, %v1531_v52  ;;  %v418_v46 = vpop.f32.mrb[37].mxu0 }
 0x12d   :  { %v419_v36 = vadd.f32 %v1531_v52, %v418_v46  ;;  %v1071_v37 = vpop.f32.mrb[38].mxu0  ;;  %681 = vmatmul.mubr.f32.vlgmr.msra.gmra.mrb[20].mxu1 %v1522_v48 }
 0x12e   :  { %v567_v38 = vmax.f32 %v427_v35, 0.0  ;;  %v430_v39 = vadd.f32 %v1071_v37, %v1531_v52  ;;  %1136 = vmatpush3.bf16.msra.mxu1 %v1135_v33  ;;  %v421_v41 = vpop.f32.mrb[39].mxu0  ;;  %750 = vmatprep.mubr.f32.mxu1 %v611_v32 }
 0x12f   :  { %v422_v44 = vadd.f32 %v1531_v52, %v421_v41  ;;  %1138 = vmatprep.subr.bf16.mxu1 %v1561_v45  ;;  %v565_v49 = vmax.f32 %v419_v36, 0.0 }
 0x130   :  { %v568_v47 = vmax.f32 %v430_v39, 0.0 }
 0x131   :  { %v566_v53 = vmax.f32 %v422_v44, 0.0 }
 0x132   :  { %v1147_v54 = vpack.c.bf16 %v568_v47, %v567_v38  ;;  %1140 = vmatpush3.bf16.msra.mxu1 %v1139_v31 }
 0x133   :  { %v1143_v14 = vpack.c.bf16 %v566_v53, %v565_v49  ;;  %v1074_v56 = vpop.f32.mrb[40].mxu0  ;;  %1142 = vmatprep.subr.bf16.mxu1 %v1580_v18 }
 0x134   :  { %v443_v48 = vadd.f32 %v1074_v56, %v1531_v52  ;;  %v434_v57 = vpop.f32.mrb[41].mxu0 }
 0x135   :  { %v435_v58 = vadd.f32 %v1531_v52, %v434_v57  ;;  %v1075_v59 = vpop.f32.mrb[42].mxu0 }
 0x136   :  { %v571_v12 = vmax.f32 %v443_v48, 0.0  ;;  %v446_v60 = vadd.f32 %v1075_v59, %v1531_v52  ;;  %1144 = vmatpush3.bf16.msra.mxu1 %v1143_v14  ;;  %v437_v45 = vpop.f32.mrb[43].mxu0 }
 0x137   :  { %v438_v61 = vadd.f32 %v1531_v52, %v437_v45  ;;  %1146 = vmatprep.subr.bf16.mxu1 %v1577_v13  ;;  %v569_v63 = vmax.f32 %v435_v58, 0.0  ;;  %v1232_v52 = vmov 0.0   ;;  %v756_v13 = vld [vmem:[%s1692_s4] sm:$0xff]  ;;  %s1234_s4 = smov [#allocation2]  }
 0x138   :  { %v572_v62 = vmax.f32 %v446_v60, 0.0 }
 0x139   :  { %v570_v0 = vmax.f32 %v438_v61, 0.0 }
 0x13a   :  { %v1155_v1 = vpack.c.bf16 %v572_v62, %v571_v12  ;;  %1148 = vmatpush3.bf16.msra.mxu1 %v1147_v54 }
 0x13b   :  { %v1151_v18 = vpack.c.bf16 %v570_v0, %v569_v63  ;;  %1150 = vmatprep.subr.bf16.mxu1 %v1596_v55 }
 0x13e   :  { %1152 = vmatpush3.bf16.msra.mxu1 %v1151_v18 }
 0x13f   :  { %1154 = vmatprep.subr.bf16.mxu1 %v1593_v50 }
 0x142   :  { %1156 = vmatpush3.bf16.msra.mxu1 %v1155_v1 }
 0x143   :  { %1158 = vmatprep.subr.bf16.mxu1 %v1608_v27 }
 0x146   :  { %1160 = vmatpush3.bf16.msra.mxu1 %v1548_v19 }
 0x147   :  { %1162 = vmatprep.subr.bf16.mxu1 %v1605_v24 }
 0x14a   :  { %1164 = vmatpush3.bf16.msra.mxu1 %v1545_v16  ;;  %v917_v16 = vld [vmem:[%s1693_s5] ss:$0 sm:$0xff]  ;;  %s862_s5 = sshll.u32 %s1234_s4, 4  ;;  %s863_s5 = int_to_ptr.vmem [resolvable:$true] %s862_s5 }
 0x14b   :  { %1096 = vmatprep.subr.mxu1 %v1232_v52  ;;  %s1183_s23 = scalar_lea.vmem %s863_s5, 32  ;;  %p1188_p1 = scmp.lt.s32.totalorder %s863_s5, %s863_s5 }
 0x14c   :  { %p1184_p0 = scmp.ne.s32.totalorder %s863_s5, %s1183_s23  ;;  %p1189_p2 = scmp.lt.s32.totalorder %s1183_s23, %s1183_s23 }
 0x14d   :  { %751 = vmatmul.mubr.f32.vlgmr.msra.gmra.mrb[22].mxu1 %v1526_v51  ;;  %v840_v51 = vand.u32 127, %v599_v43 }
 0x14e   :  { %1097 = vmatpush3.msra.mxu1 %v756_v13  ;;  %1098 = vmatprep.mubr.msk.f32.mxu1 %vm1233_vm2, %v1232_v52  ;;  %p1190_p3 = por %p1189_p2, %p1188_p1 }
 0x14f   :  { %vm841_vm4 = vcmp.lt.s32.totalorder %v840_v51, 10 }
 0x150   :  { %p1191_p4 = pnand %p1190_p3, %p1184_p0 }
 0x200   :  { %v986_v50 = vpop.f32.mrb[20].mxu1 }
 0x201   :  { %v987_v55 = vpop.f32.mrb[21].mxu1 }
 0x202   :  { %v988_v27 = vadd.f32 %v987_v55, %v986_v50 }
 0x220   :  { %v1021_v2 = vpop.f32.mrb[22].mxu1 }
 0x221   :  { %v1022_v19 = vpop.f32.mrb[23].mxu1 }
 0x222   :  { %v1023_v3 = vadd.f32 %v1022_v19, %v1021_v2 }
 0x224   :  { %v753_v24 = vadd.f32 %v1023_v3, %v988_v27 }
 0x226   :  { %1099 = vmatmul.mubr.msk.f32.vlgmr.msra.gmra.mrb[24].mxu1 %vm764_vm3, %v753_v24 }
 0x2f9   :  { %v834_v42 = vpop.f32.mrb[24].mxu1 }
 0x2fa   :  { %v835_v4 = vadd.f32 %v917_v16, %v834_v42  ;;  %v1100_v5 = vpop.f32.mrb[25].mxu1 }
 0x2fc   :  { %838 = vst [vmem:[#allocation2] sm:$0x3] %v835_v4  ;;  %v842_v6 = vsel %vm841_vm4, %v835_v4, -inf }
 0x2fd   :  { %v843_v7 = vsel %vm236_vm1, %v842_v6, -inf }
 0x2fe   :  { %844 = vmax.xlane.f32.xlu0 %v843_v7 }
 0x38b   :  { %v845_v40 = vpop.xlane.xlu0 %844 }
 0x38c   :  { %v846_v9 = vsub.f32 %v835_v4, %v845_v40 }
 0x38e   :  { %v847_v11 = vmul.f32 1.442695, %v846_v9 }
 0x390   :  { %1179 = vpow2.f32 %v847_v11 }
 0x39a   :  { %v1180_v15 = vpop.eup %1179 }
 0x39b   :  { %v849_v17 = vsel %vm841_vm4, %v1180_v15, 0.0 }
 0x39c   :  { %v850_v43 = vsel %vm236_vm1, %v849_v17, 0.0 }
 0x39d   :  { %851 = vadd.xlane.f32.xlu0 %v850_v43 }
 0x39e   :  { %1194 = shalt.err (!%p1191_p4)
}
 0x39f   :  { %s1195_s26 = scalar_lea.hbm %s1694_s6, 32 }
 0x3a0   :  { %p1196_p5 = scmp.ne.s32.totalorder %s1694_s6, %s1195_s26  ;;  %p1199_p6 = scmp.lt.u32.totalorder %s1195_s26, %s1694_s6 }
 0x3a2   :  { %p1201_p7 = pnand %p1199_p6, %p1196_p5 }
 0x3a4   :  { %1204 = shalt.err (!%p1201_p7)
}
 0x3a5   :  { %865 = dma.vmem_to_hbm [thread:$0]  %s863_s5, 32, %s1694_s6, [#allocation3]  }
 0x3a6   :  { %s1235_s10 = smov [#allocation4]  }
 0x3a7   :  { %s872_s11 = sshll.u32 %s1235_s10, 4  ;;  %s873_s11 = int_to_ptr.vmem [resolvable:$true] %s872_s11 }
 0x3a8   :  { %s1205_s12 = scalar_lea.vmem %s873_s11, 32  ;;  %p1210_p9 = scmp.lt.s32.totalorder %s873_s11, %s873_s11 }
 0x3a9   :  { %p1206_p8 = scmp.ne.s32.totalorder %s873_s11, %s1205_s12  ;;  %p1211_p10 = scmp.lt.s32.totalorder %s1205_s12, %s1205_s12 }
 0x3ab   :  { %p1212_p11 = por %p1211_p10, %p1210_p9 }
 0x3ad   :  { %p1213_p12 = pnand %p1212_p11, %p1206_p8 }
 0x42a   :  { %v852_v20 = vpop.xlane.xlu0 %851 }
 0x42b   :  { %1181 = vrcp.f32 %v852_v20 }
 0x435   :  { %v1182_v21 = vpop.eup %1181 }
 0x436   :  { %v854_v22 = vmul.f32 %v1182_v21, %v849_v17 }
 0x438   :  { %855 = vst [vmem:[#allocation4] sm:$0x3] %v854_v22 }
 0x439   :  { %1216 = shalt.err (!%p1213_p12)
}
 0x43a   :  { %s1217_s15 = scalar_lea.hbm %s1695_s7, 32 }
 0x43b   :  { %p1218_p13 = scmp.ne.s32.totalorder %s1695_s7, %s1217_s15  ;;  %p1221_p0 = scmp.lt.u32.totalorder %s1217_s15, %s1695_s7 }
 0x43d   :  { %p1223_p1 = pnand %p1221_p0, %p1218_p13 }
 0x43f   :  { %1226 = shalt.err (!%p1223_p1)
}
 0x440   :  { %875 = dma.vmem_to_hbm [thread:$0]  %s873_s11, 32, %s1695_s7, [#allocation5]  }
 0x441   :  { %1227 = dma.done.wait [#allocation3], 32  }
 0x442   :  { %1228 = vsyncadd [#allocation3], 4294967264 }
 0x443   :  { %1229 = dma.done.wait [#allocation5], 32  }
 0x444   :  { %1230 = vsyncadd [#allocation5], 4294967264 }
 0x445   :  { %882 = vsyncpa [#allocation3], 1 }
 0x446   :  { %883 = vsyncpa [#allocation5], 1 }

</bundles_post_ra>
